<compile_context>
chip_gen: v6e
topology: v6e:2x2x1
jax: 0.10.0
libtpu: 0.0.40
codegen_flags: <defaults>
</compile_context>

<pallas_src>
import functools

import jax
import jax.numpy as jnp
from jax.experimental import pallas as pl
from jax.experimental.pallas import tpu as pltpu

LANE = 128      # lane width (last dim)
SUBLANE = 8     # f32 sublane count (second-to-last dim)


def _round_up(x, m):
    return ((x + m - 1) // m) * m


# --------------------------------------------------------------------------
# Parameter init (matches GymNetwork.__init__) + one-time kernel packing
# --------------------------------------------------------------------------
def init_gym_network_params(key, num_inputs, num_outputs, hidden_layers):
    """Per-layer weight (out,in) and bias (out,) drawn Uniform(-1, 1),
    exactly like nn.init.uniform_(param, -1, 1) on nn.Linear parameters."""
    latent_sizes = [num_inputs, *hidden_layers, num_outputs]
    params = []
    for in_size, out_size in zip(latent_sizes[:-1], latent_sizes[1:]):
        key, kw, kb = jax.random.split(key, 3)
        w = jax.random.uniform(kw, (out_size, in_size), jnp.float32, -1.0, 1.0)
        b = jax.random.uniform(kb, (out_size,), jnp.float32, -1.0, 1.0)
        params.append((w, b))
    return params


def pack_params(params):
    """One-time conversion to kernel-ready layout: W.T zero-padded to
    (in_pad, out_pad), bias as (1, out_pad).  Done once at setup, never in the
    per-forward path."""
    packed = []
    for w, b in params:
        out_size, in_size = w.shape
        in_pad = _round_up(in_size, LANE)
        out_pad = _round_up(out_size, LANE)
        w_p = jnp.zeros((in_pad, out_pad), jnp.float32).at[:in_size, :out_size].set(w.T)
        b_p = jnp.zeros((1, out_pad), jnp.float32).at[:, :out_size].set(b)
        packed.append((w_p, b_p))
    return packed


# --------------------------------------------------------------------------
# Fused MLP kernel: one pallas_call for the whole network
# --------------------------------------------------------------------------
def _make_mlp_kernel(num_layers):
    def kernel(x_ref, *refs):
        # refs = (w0, b0, w1, b1, ..., o_ref)
        o_ref = refs[-1]
        latent = x_ref[...]                       # (B_tile, in_pad) f32
        for layer in range(num_layers):           # static unroll
            w = refs[2 * layer][...]              # (in_pad, out_pad)
            b = refs[2 * layer + 1][...]          # (1, out_pad)
            acc = jnp.dot(latent, w, preferred_element_type=jnp.float32)
            latent = jax.nn.sigmoid(acc + b)      # f32 sigmoid (EUP)
        o_ref[...] = latent.astype(o_ref.dtype)
    return kernel


def gym_network_forward(obs, packed_params, num_outputs, b_tile=256):
    """Forward pass of GymNetwork: sigmoid after EVERY layer (incl. the last).

    obs:            (B, num_inputs) f32
    packed_params:  list of (W_padded (in_pad,out_pad), b_padded (1,out_pad))
    returns         (B, num_outputs) f32
    """
    B, num_inputs = obs.shape
    in_pad = packed_params[0][0].shape[0]
    out_pad = packed_params[-1][0].shape[1]
    num_layers = len(packed_params)

    # Batch tiling: sublane-aligned, capped so (tile, 128) blocks + all weights
    # stay far under VMEM limits even on v7x with double-buffering.
    tile = _round_up(min(b_tile, _round_up(B, SUBLANE)), SUBLANE)
    b_pad = _round_up(B, tile)
    grid = (b_pad // tile,)

    # Zero-pad obs to (b_pad, in_pad): lane-dense loads, exact math (see above).
    obs_p = jnp.zeros((b_pad, in_pad), jnp.float32).at[:B, :num_inputs].set(obs)

    flat_params = []
    in_specs = [pl.BlockSpec((tile, in_pad), lambda i: (i, 0))]
    for w_p, b_p in packed_params:
        flat_params.extend([w_p, b_p])
        # Weights/biases: full-array blocks, resident across all grid steps.
        in_specs.append(pl.BlockSpec(w_p.shape, lambda i: (0, 0)))
        in_specs.append(pl.BlockSpec(b_p.shape, lambda i: (0, 0)))

    out_p = pl.pallas_call(
        _make_mlp_kernel(num_layers),
        out_shape=jax.ShapeDtypeStruct((b_pad, out_pad), jnp.float32),
        grid=grid,
        in_specs=in_specs,
        out_specs=pl.BlockSpec((tile, out_pad), lambda i: (i, 0)),
        compiler_params=pltpu.CompilerParams(
            dimension_semantics=("parallel",)),  # shards batch across TCs on v7x
    )(obs_p, *flat_params)

    return out_p[:B, :num_outputs]


# --------------------------------------------------------------------------
# Pure-JAX reference (mirrors the PyTorch forward) for correctness checking
# --------------------------------------------------------------------------
def gym_network_reference(obs, params):
    latent = obs
    for w, b in params:                       # w: (out, in), b: (out,)
        latent = jax.nn.sigmoid(latent @ w.T + b)
    return latent


if __name__ == "__main__":
    key = jax.random.PRNGKey(0)

    batch = 4
    num_inputs = 16
    hidden_layers = (32, 32)
    num_outputs = 8

    k_obs, k_params = jax.random.split(key)
    obs = jax.random.normal(k_obs, (batch, num_inputs), jnp.float32)
    params = init_gym_network_params(k_params, num_inputs, num_outputs, hidden_layers)
    packed = pack_params(params)              # one-time kernel-ready packing

    fwd = jax.jit(functools.partial(gym_network_forward,
                                    num_outputs=num_outputs, b_tile=256))
    out = fwd(obs, packed)
    jax.block_until_ready(out)

    assert out.shape == (batch, num_outputs)

    ref = gym_network_reference(obs, params)
    assert jnp.allclose(out, ref, atol=1e-5, rtol=1e-5), (
        f"max abs err {jnp.max(jnp.abs(out - ref))}")

    print("KERNEL_OK")
</pallas_src>

<mosaic_0001>
module attributes {stable_mosaic.version = 11 : i64} {
  func.func @kernel(%arg0: i32, %arg1: memref<8x128xf32, #tpu.memory_space<vmem>>, %arg2: memref<128x128xf32, #tpu.memory_space<vmem>>, %arg3: memref<1x128xf32, #tpu.memory_space<vmem>>, %arg4: memref<128x128xf32, #tpu.memory_space<vmem>>, %arg5: memref<1x128xf32, #tpu.memory_space<vmem>>, %arg6: memref<128x128xf32, #tpu.memory_space<vmem>>, %arg7: memref<1x128xf32, #tpu.memory_space<vmem>>, %arg8: memref<8x128xf32, #tpu.memory_space<vmem>>) attributes {dimension_semantics = [#tpu.dimension_semantics<parallel>], iteration_bounds = array<i64: 1>, scalar_prefetch = 0 : i64, scratch_operands = 0 : i64, tpu.core_type = #tpu.core_type<tc>, window_params = [{transform_indices = @transform_0, window_bounds = array<i64: 8, 128>}, {pipeline_mode = #tpu.pipeline_mode<synchronous>, transform_indices = @transform_1, window_bounds = array<i64: 128, 128>}, {pipeline_mode = #tpu.pipeline_mode<synchronous>, transform_indices = @transform_2, window_bounds = array<i64: 1, 128>}, {pipeline_mode = #tpu.pipeline_mode<synchronous>, transform_indices = @transform_3, window_bounds = array<i64: 128, 128>}, {pipeline_mode = #tpu.pipeline_mode<synchronous>, transform_indices = @transform_4, window_bounds = array<i64: 1, 128>}, {pipeline_mode = #tpu.pipeline_mode<synchronous>, transform_indices = @transform_5, window_bounds = array<i64: 128, 128>}, {pipeline_mode = #tpu.pipeline_mode<synchronous>, transform_indices = @transform_6, window_bounds = array<i64: 1, 128>}, {transform_indices = @transform_7, window_bounds = array<i64: 8, 128>}]} {
    %c0 = arith.constant 0 : index
    %c0_0 = arith.constant 0 : index
    %0 = vector.load %arg1[%c0, %c0_0] : memref<8x128xf32, #tpu.memory_space<vmem>>, vector<8x128xf32>
    %c0_1 = arith.constant 0 : index
    %c0_2 = arith.constant 0 : index
    %1 = vector.load %arg2[%c0_1, %c0_2] : memref<128x128xf32, #tpu.memory_space<vmem>>, vector<128x128xf32>
    %c0_3 = arith.constant 0 : index
    %c0_4 = arith.constant 0 : index
    %2 = vector.load %arg3[%c0_3, %c0_4] : memref<1x128xf32, #tpu.memory_space<vmem>>, vector<1x128xf32>
    %cst = arith.constant dense<0.000000e+00> : vector<8x128xf32>
    %3 = tpu.matmul %0, %1, %cst {dimension_numbers = #tpu.dot_dimension_numbers<[1], [0], [0], [1], [0, 0, 1, 1], [], []>} : vector<8x128xf32>, vector<128x128xf32>, vector<8x128xf32> -> vector<8x128xf32>
    %4 = vector.broadcast %2 : vector<1x128xf32> to vector<8x128xf32>
    %5 = arith.addf %3, %4 : vector<8x128xf32>
    %6 = arith.negf %5 : vector<8x128xf32>
    %7 = math.exp %6 : vector<8x128xf32>
    %cst_5 = arith.constant 1.000000e+00 : f32
    %8 = vector.broadcast %cst_5 : f32 to vector<8x128xf32>
    %9 = arith.addf %8, %7 : vector<8x128xf32>
    %10 = arith.divf %8, %9 : vector<8x128xf32>
    %c0_6 = arith.constant 0 : index
    %c0_7 = arith.constant 0 : index
    %11 = vector.load %arg4[%c0_6, %c0_7] : memref<128x128xf32, #tpu.memory_space<vmem>>, vector<128x128xf32>
    %c0_8 = arith.constant 0 : index
    %c0_9 = arith.constant 0 : index
    %12 = vector.load %arg5[%c0_8, %c0_9] : memref<1x128xf32, #tpu.memory_space<vmem>>, vector<1x128xf32>
    %cst_10 = arith.constant dense<0.000000e+00> : vector<8x128xf32>
    %13 = tpu.matmul %10, %11, %cst_10 {dimension_numbers = #tpu.dot_dimension_numbers<[1], [0], [0], [1], [0, 0, 1, 1], [], []>} : vector<8x128xf32>, vector<128x128xf32>, vector<8x128xf32> -> vector<8x128xf32>
    %14 = vector.broadcast %12 : vector<1x128xf32> to vector<8x128xf32>
    %15 = arith.addf %13, %14 : vector<8x128xf32>
    %16 = arith.negf %15 : vector<8x128xf32>
    %17 = math.exp %16 : vector<8x128xf32>
    %cst_11 = arith.constant 1.000000e+00 : f32
    %18 = vector.broadcast %cst_11 : f32 to vector<8x128xf32>
    %19 = arith.addf %18, %17 : vector<8x128xf32>
    %20 = arith.divf %18, %19 : vector<8x128xf32>
    %c0_12 = arith.constant 0 : index
    %c0_13 = arith.constant 0 : index
    %21 = vector.load %arg6[%c0_12, %c0_13] : memref<128x128xf32, #tpu.memory_space<vmem>>, vector<128x128xf32>
    %c0_14 = arith.constant 0 : index
    %c0_15 = arith.constant 0 : index
    %22 = vector.load %arg7[%c0_14, %c0_15] : memref<1x128xf32, #tpu.memory_space<vmem>>, vector<1x128xf32>
    %cst_16 = arith.constant dense<0.000000e+00> : vector<8x128xf32>
    %23 = tpu.matmul %20, %21, %cst_16 {dimension_numbers = #tpu.dot_dimension_numbers<[1], [0], [0], [1], [0, 0, 1, 1], [], []>} : vector<8x128xf32>, vector<128x128xf32>, vector<8x128xf32> -> vector<8x128xf32>
    %24 = vector.broadcast %22 : vector<1x128xf32> to vector<8x128xf32>
    %25 = arith.addf %23, %24 : vector<8x128xf32>
    %26 = arith.negf %25 : vector<8x128xf32>
    %27 = math.exp %26 : vector<8x128xf32>
    %cst_17 = arith.constant 1.000000e+00 : f32
    %28 = vector.broadcast %cst_17 : f32 to vector<8x128xf32>
    %29 = arith.addf %28, %27 : vector<8x128xf32>
    %30 = arith.divf %28, %29 : vector<8x128xf32>
    %c0_18 = arith.constant 0 : index
    %c0_19 = arith.constant 0 : index
    %31 = vector.load %arg8[%c0_18, %c0_19] : memref<8x128xf32, #tpu.memory_space<vmem>>, vector<8x128xf32>
    tpu.vector_store %arg8[%c0_18, %c0_19], %30 {strides = array<i32>} : memref<8x128xf32, #tpu.memory_space<vmem>>, vector<8x128xf32>,
    return
  }
  func.func @transform_0(%arg0: i32) -> (i32, i32) {
    %c0_i32 = arith.constant 0 : i32
    %c0_i32_0 = arith.constant 0 : i32
    return %arg0, %c0_i32 : i32, i32
  }
  func.func @transform_1(%arg0: i32) -> (i32, i32) {
    %c0_i32 = arith.constant 0 : i32
    %c0_i32_0 = arith.constant 0 : i32
    %c0_i32_1 = arith.constant 0 : i32
    return %c0_i32, %c0_i32_0 : i32, i32
  }
  func.func @transform_2(%arg0: i32) -> (i32, i32) {
    %c0_i32 = arith.constant 0 : i32
    %c0_i32_0 = arith.constant 0 : i32
    %c0_i32_1 = arith.constant 0 : i32
    return %c0_i32, %c0_i32_0 : i32, i32
  }
  func.func @transform_3(%arg0: i32) -> (i32, i32) {
    %c0_i32 = arith.constant 0 : i32
    %c0_i32_0 = arith.constant 0 : i32
    %c0_i32_1 = arith.constant 0 : i32
    return %c0_i32, %c0_i32_0 : i32, i32
  }
  func.func @transform_4(%arg0: i32) -> (i32, i32) {
    %c0_i32 = arith.constant 0 : i32
    %c0_i32_0 = arith.constant 0 : i32
    %c0_i32_1 = arith.constant 0 : i32
    return %c0_i32, %c0_i32_0 : i32, i32
  }
  func.func @transform_5(%arg0: i32) -> (i32, i32) {
    %c0_i32 = arith.constant 0 : i32
    %c0_i32_0 = arith.constant 0 : i32
    %c0_i32_1 = arith.constant 0 : i32
    return %c0_i32, %c0_i32_0 : i32, i32
  }
  func.func @transform_6(%arg0: i32) -> (i32, i32) {
    %c0_i32 = arith.constant 0 : i32
    %c0_i32_0 = arith.constant 0 : i32
    %c0_i32_1 = arith.constant 0 : i32
    return %c0_i32, %c0_i32_0 : i32, i32
  }
  func.func @transform_7(%arg0: i32) -> (i32, i32) {
    %c0_i32 = arith.constant 0 : i32
    %c0_i32_0 = arith.constant 0 : i32
    return %arg0, %c0_i32 : i32, i32
  }
}

</mosaic_0001>

<bundles_post_ra>
// kernel: gym_network_forward.1
= control target key start
LH: loop header
LB: loop body
LE: loop exit
PB: predicated region body
PF: predicated region fallthrough
CT: control target
= control target key end

     0   :  { %12 = vsyncpa [#allocation3], 0  ;;  %s742_s0 = inlined_call_operand.vmem [shape: f32[8,128], index: 0, kind: input, shape index: {}]   ;;  %s743_s1 = inlined_call_operand.hbm [shape: f32[128,128], index: 1, kind: input, shape index: {}]   ;;  %s744_s2 = inlined_call_operand.vmem [shape: f32[1,128], index: 2, kind: input, shape index: {}]   ;;  %s745_s3 = inlined_call_operand.hbm [shape: f32[128,128], index: 3, kind: input, shape index: {}]   ;;  %s746_s4 = inlined_call_operand.vmem [shape: f32[1,128], index: 4, kind: input, shape index: {}]   ;;  %s747_s5 = inlined_call_operand.hbm [shape: f32[128,128], index: 5, kind: input, shape index: {}]   ;;  %s748_s6 = inlined_call_operand.vmem [shape: f32[1,128], index: 6, kind: input, shape index: {}]   ;;  %s749_s7 = inlined_call_operand.vmem [shape: f32[8,128], index: 7, kind: output, shape index: {}]  }
   0x1   :  { %13 = vsyncpa [#allocation5], 0  ;;  %s617_s24 = smov [#allocation4]   ;;  %s618_s26 = smov [#allocation2]  }
   0x2   :  { %s35_s25 = sshll.u32 %s617_s24, 4  ;;  %s21_s27 = sshll.u32 %s618_s26, 4  ;;  %s36_s25 = int_to_ptr.vmem [resolvable:$true] %s35_s25  ;;  %s22_s27 = int_to_ptr.vmem [resolvable:$true] %s21_s27 }
   0x3   :  { %s561_s28 = scalar_lea.vmem %s36_s25, 2048  ;;  %p566_p1 = scmp.lt.s32.totalorder %s36_s25, %s36_s25 }
   0x4   :  { %p562_p0 = scmp.ne.s32.totalorder %s36_s25, %s561_s28  ;;  %p567_p2 = scmp.lt.s32.totalorder %s561_s28, %s561_s28 }
   0x6   :  { %p568_p3 = por %p567_p2, %p566_p1 }
   0x8   :  { %p569_p4 = pnand %p568_p3, %p562_p0 }
   0xa   :  { %572 = shalt.err (!%p569_p4)
}
   0xb   :  { %s619_s29 = smov 128   ;;  %s620_s30 = smov 8  }
   0xc   :  { %41 = dma.hbm_to_vmem [thread:$0]  %s745_s3, 2048, %s36_s25, [#allocation5], %s619_s29, %s619_s29, %s620_s30  }
   0xd   :  { %s581_s10 = scalar_lea.vmem %s22_s27, 2048  ;;  %p586_p6 = scmp.lt.s32.totalorder %s22_s27, %s22_s27 }
   0xe   :  { %p582_p5 = scmp.ne.s32.totalorder %s22_s27, %s581_s10  ;;  %p587_p7 = scmp.lt.s32.totalorder %s581_s10, %s581_s10 }
  0x10   :  { %p588_p8 = por %p587_p7, %p586_p6 }
  0x12   :  { %p589_p9 = pnand %p588_p8, %p582_p5 }
  0x14   :  { %592 = shalt.err (!%p589_p9)
}
  0x15   :  { %27 = dma.hbm_to_vmem [thread:$0]  %s743_s1, 2048, %s22_s27, [#allocation3], %s619_s29, %s619_s29, %s620_s30  }
  0x16   :  { %s621_s13 = smov [#allocation6]  }
  0x17   :  { %s49_s14 = sshll.u32 %s621_s13, 4  ;;  %s50_s14 = int_to_ptr.vmem [resolvable:$true] %s49_s14 }
  0x18   :  { %s601_s15 = scalar_lea.vmem %s50_s14, 2048  ;;  %p606_p11 = scmp.lt.s32.totalorder %s50_s14, %s50_s14 }
  0x19   :  { %p602_p10 = scmp.ne.s32.totalorder %s50_s14, %s601_s15  ;;  %p607_p12 = scmp.lt.s32.totalorder %s601_s15, %s601_s15 }
  0x1b   :  { %p608_p13 = por %p607_p12, %p606_p11 }
  0x1d   :  { %p609_p0 = pnand %p608_p13, %p602_p10 }
  0x1f   :  { %612 = shalt.err (!%p609_p0)
}
  0x20   :  { %55 = dma.hbm_to_vmem [thread:$0]  %s747_s5, 2048, %s50_s14, [#allocation5], %s619_s29, %s619_s29, %s620_s30  }
  0x21   :  { %613 = dma.done.wait [#allocation3], 2048  }
  0x22   :  { %614 = vsyncadd [#allocation3], 4294965248 }
  0x23   :  { %615 = dma.done.wait [#allocation5], 4096  }
  0x24   :  { %616 = vsyncadd [#allocation5], 4294963200  ;;  %v622_v0 = vmov 0.0   ;;  %vm623_vm0 = vmmov 0   ;;  %v83_v1 = vld [vmem:[#allocation2 + $0x78] sm:$0xff]  ;;  %v82_v2 = vld [vmem:[#allocation2 + $0x70] sm:$0xff] }
  0x25   :  { %429 = vmatprep.subr.mxu0 %v622_v0  ;;  %461 = vmatprep.mubr.msk.f32.mxu0 %vm623_vm0, %v622_v0  ;;  %v81_v3 = vld [vmem:[#allocation2 + $0x68] sm:$0xff]  ;;  %v80_v4 = vld [vmem:[#allocation2 + $0x60] sm:$0xff]  ;;  %v79_v5 = vld [vmem:[#allocation2 + $0x58] sm:$0xff] }
  0x26   :  { %464 = vmatprep.subr.mxu1 %v622_v0  ;;  %496 = vmatprep.mubr.msk.f32.mxu1 %vm623_vm0, %v622_v0  ;;  %v78_v6 = vld [vmem:[#allocation2 + $0x50] sm:$0xff]  ;;  %v77_v7 = vld [vmem:[#allocation2 + $0x48] sm:$0xff]  ;;  %v76_v8 = vld [vmem:[#allocation2 + $0x40] sm:$0xff] }
  0x27   :  { %430 = vmatpush3.msra.mxu0 %v83_v1  ;;  %v75_v9 = vld [vmem:[#allocation2 + $0x38] sm:$0xff]  ;;  %v74_v10 = vld [vmem:[#allocation2 + $0x30] sm:$0xff]  ;;  %v73_v11 = vld [vmem:[#allocation2 + $0x28] sm:$0xff] }
  0x28   :  { %431 = vmatprep.subr.mxu0 %v622_v0  ;;  %v72_v12 = vld [vmem:[#allocation2 + $0x20] sm:$0xff]  ;;  %v71_v13 = vld [vmem:[#allocation2 + $0x18] sm:$0xff]  ;;  %v70_v14 = vld [vmem:[#allocation2 + $0x10] sm:$0xff] }
  0x29   :  { %432 = vmatpush3.msra.mxu0 %v82_v2  ;;  %v69_v15 = vld [vmem:[#allocation2 + $0x8] sm:$0xff]  ;;  %v68_v16 = vld [vmem:[#allocation2] sm:$0xff]  ;;  %v182_v18 = vld [vmem:[#allocation4 + $0x78] sm:$0xff] }
  0x2a   :  { %433 = vmatprep.subr.mxu0 %v622_v0  ;;  %v67_v17 = vld [vmem:[%s742_s0] sm:$0xff]  ;;  %465 = vmatpush3.msra.mxu1 %v182_v18  ;;  %v181_v19 = vld [vmem:[#allocation4 + $0x70] sm:$0xff]  ;;  %v180_v20 = vld [vmem:[#allocation4 + $0x68] sm:$0xff] }
  0x2b   :  { %434 = vmatpush3.msra.mxu0 %v81_v3  ;;  %466 = vmatprep.subr.mxu1 %v622_v0  ;;  %v179_v21 = vld [vmem:[#allocation4 + $0x60] sm:$0xff]  ;;  %v178_v22 = vld [vmem:[#allocation4 + $0x58] sm:$0xff]  ;;  %v177_v23 = vld [vmem:[#allocation4 + $0x50] sm:$0xff] }
  0x2c   :  { %435 = vmatprep.subr.mxu0 %v622_v0  ;;  %467 = vmatpush3.msra.mxu1 %v181_v19  ;;  %v176_v24 = vld [vmem:[#allocation4 + $0x48] sm:$0xff]  ;;  %v175_v25 = vld [vmem:[#allocation4 + $0x40] sm:$0xff]  ;;  %v174_v26 = vld [vmem:[#allocation4 + $0x38] sm:$0xff] }
  0x2d   :  { %436 = vmatpush3.msra.mxu0 %v80_v4  ;;  %468 = vmatprep.subr.mxu1 %v622_v0  ;;  %v173_v27 = vld [vmem:[#allocation4 + $0x30] sm:$0xff]  ;;  %v172_v28 = vld [vmem:[#allocation4 + $0x28] sm:$0xff]  ;;  %v171_v29 = vld [vmem:[#allocation4 + $0x20] sm:$0xff] }
  0x2e   :  { %437 = vmatprep.subr.mxu0 %v622_v0  ;;  %469 = vmatpush3.msra.mxu1 %v180_v20  ;;  %v170_v30 = vld [vmem:[#allocation4 + $0x18] sm:$0xff]  ;;  %v169_v31 = vld [vmem:[#allocation4 + $0x10] sm:$0xff]  ;;  %v168_v32 = vld [vmem:[#allocation4 + $0x8] sm:$0xff] }
  0x2f   :  { %438 = vmatpush3.msra.mxu0 %v79_v5  ;;  %470 = vmatprep.subr.mxu1 %v622_v0  ;;  %v167_v33 = vld [vmem:[#allocation4] sm:$0xff]  ;;  %v281_v42 = vld [vmem:[#allocation6 + $0x78] sm:$0xff]  ;;  %v280_v43 = vld [vmem:[#allocation6 + $0x70] sm:$0xff] }
  0x30   :  { %439 = vmatprep.subr.mxu0 %v622_v0  ;;  %471 = vmatpush3.msra.mxu1 %v179_v21  ;;  %v372_v34 = vld [vmem:[%s744_s2] ss:$0 sm:$0xff]  ;;  %v279_v44 = vld [vmem:[#allocation6 + $0x68] sm:$0xff]  ;;  %v277_v46 = vld [vmem:[#allocation6 + $0x58] sm:$0xff] }
  0x31   :  { %440 = vmatpush3.msra.mxu0 %v78_v6  ;;  %472 = vmatprep.subr.mxu1 %v622_v0  ;;  %v278_v45 = vld [vmem:[#allocation6 + $0x60] sm:$0xff]  ;;  %v276_v47 = vld [vmem:[#allocation6 + $0x50] sm:$0xff]  ;;  %v275_v48 = vld [vmem:[#allocation6 + $0x48] sm:$0xff] }
  0x32   :  { %441 = vmatprep.subr.mxu0 %v622_v0  ;;  %473 = vmatpush3.msra.mxu1 %v178_v22  ;;  %v274_v49 = vld [vmem:[#allocation6 + $0x40] sm:$0xff]  ;;  %v273_v50 = vld [vmem:[#allocation6 + $0x38] sm:$0xff]  ;;  %v272_v51 = vld [vmem:[#allocation6 + $0x30] sm:$0xff] }
  0x33   :  { %442 = vmatpush3.msra.mxu0 %v77_v7  ;;  %474 = vmatprep.subr.mxu1 %v622_v0  ;;  %v271_v52 = vld [vmem:[#allocation6 + $0x28] sm:$0xff]  ;;  %v270_v53 = vld [vmem:[#allocation6 + $0x20] sm:$0xff]  ;;  %v269_v54 = vld [vmem:[#allocation6 + $0x18] sm:$0xff] }
  0x34   :  { %443 = vmatprep.subr.mxu0 %v622_v0  ;;  %475 = vmatpush3.msra.mxu1 %v177_v23  ;;  %v268_v55 = vld [vmem:[#allocation6 + $0x10] sm:$0xff]  ;;  %v267_v56 = vld [vmem:[#allocation6 + $0x8] sm:$0xff]  ;;  %v266_v57 = vld [vmem:[#allocation6] sm:$0xff] }
  0x35   :  { %444 = vmatpush3.msra.mxu0 %v76_v8  ;;  %476 = vmatprep.subr.mxu1 %v622_v0  ;;  %v374_v58 = vld [vmem:[%s746_s4] ss:$0 sm:$0xff] }
  0x36   :  { %445 = vmatprep.subr.mxu0 %v622_v0  ;;  %477 = vmatpush3.msra.mxu1 %v176_v24  ;;  %v376_v3 = vld [vmem:[%s748_s6] ss:$0 sm:$0xff] }
  0x37   :  { %446 = vmatpush3.msra.mxu0 %v75_v9  ;;  %478 = vmatprep.subr.mxu1 %v622_v0 }
  0x38   :  { %447 = vmatprep.subr.mxu0 %v622_v0  ;;  %479 = vmatpush3.msra.mxu1 %v175_v25 }
  0x39   :  { %448 = vmatpush3.msra.mxu0 %v74_v10  ;;  %480 = vmatprep.subr.mxu1 %v622_v0 }
  0x3a   :  { %449 = vmatprep.subr.mxu0 %v622_v0  ;;  %481 = vmatpush3.msra.mxu1 %v174_v26 }
  0x3b   :  { %450 = vmatpush3.msra.mxu0 %v73_v11  ;;  %482 = vmatprep.subr.mxu1 %v622_v0 }
  0x3c   :  { %451 = vmatprep.subr.mxu0 %v622_v0  ;;  %483 = vmatpush3.msra.mxu1 %v173_v27 }
  0x3d   :  { %452 = vmatpush3.msra.mxu0 %v72_v12  ;;  %484 = vmatprep.subr.mxu1 %v622_v0 }
  0x3e   :  { %453 = vmatprep.subr.mxu0 %v622_v0  ;;  %485 = vmatpush3.msra.mxu1 %v172_v28 }
  0x3f   :  { %454 = vmatpush3.msra.mxu0 %v71_v13  ;;  %486 = vmatprep.subr.mxu1 %v622_v0 }
  0x40   :  { %455 = vmatprep.subr.mxu0 %v622_v0  ;;  %487 = vmatpush3.msra.mxu1 %v171_v29 }
  0x41   :  { %456 = vmatpush3.msra.mxu0 %v70_v14  ;;  %488 = vmatprep.subr.mxu1 %v622_v0 }
  0x42   :  { %457 = vmatprep.subr.mxu0 %v622_v0  ;;  %489 = vmatpush3.msra.mxu1 %v170_v30 }
  0x43   :  { %458 = vmatpush3.msra.mxu0 %v69_v15  ;;  %490 = vmatprep.subr.mxu1 %v622_v0 }
  0x44   :  { %459 = vmatprep.subr.mxu0 %v622_v0  ;;  %491 = vmatpush3.msra.mxu1 %v169_v31 }
  0x45   :  { %460 = vmatpush3.msra.mxu0 %v68_v16  ;;  %492 = vmatprep.subr.mxu1 %v622_v0 }
  0x46   :  { %462 = vmatmul.mubr.f32.vlgmr.msra.gmra.mxu0 %v67_v17  ;;  %499 = vmatprep.subr.mxu0 %v622_v0 }
  0x47   :  { %531 = vmatprep.mubr.msk.f32.mxu0 %vm623_vm0, %v622_v0  ;;  %493 = vmatpush3.msra.mxu1 %v168_v32 }
  0x48   :  { %494 = vmatprep.subr.mxu1 %v622_v0  ;;  %500 = vmatpush3.msra.mxu0 %v281_v42 }
  0x49   :  { %495 = vmatpush3.msra.mxu1 %v167_v33  ;;  %501 = vmatprep.subr.mxu0 %v622_v0 }
  0x4a   :  { %502 = vmatpush3.msra.mxu0 %v280_v43 }
  0x4b   :  { %503 = vmatprep.subr.mxu0 %v622_v0 }
  0x4c   :  { %504 = vmatpush3.msra.mxu0 %v279_v44 }
  0x4d   :  { %505 = vmatprep.subr.mxu0 %v622_v0 }
  0x4e   :  { %506 = vmatpush3.msra.mxu0 %v278_v45 }
  0x4f   :  { %507 = vmatprep.subr.mxu0 %v622_v0 }
  0x50   :  { %508 = vmatpush3.msra.mxu0 %v277_v46 }
  0x51   :  { %509 = vmatprep.subr.mxu0 %v622_v0 }
  0x52   :  { %510 = vmatpush3.msra.mxu0 %v276_v47 }
  0x53   :  { %511 = vmatprep.subr.mxu0 %v622_v0 }
  0x54   :  { %512 = vmatpush3.msra.mxu0 %v275_v48 }
  0x55   :  { %513 = vmatprep.subr.mxu0 %v622_v0 }
  0x56   :  { %514 = vmatpush3.msra.mxu0 %v274_v49 }
  0x57   :  { %515 = vmatprep.subr.mxu0 %v622_v0 }
  0x58   :  { %516 = vmatpush3.msra.mxu0 %v273_v50 }
  0x59   :  { %517 = vmatprep.subr.mxu0 %v622_v0 }
  0x5a   :  { %518 = vmatpush3.msra.mxu0 %v272_v51 }
  0x5b   :  { %519 = vmatprep.subr.mxu0 %v622_v0 }
  0x5c   :  { %520 = vmatpush3.msra.mxu0 %v271_v52 }
  0x5d   :  { %521 = vmatprep.subr.mxu0 %v622_v0 }
  0x5e   :  { %522 = vmatpush3.msra.mxu0 %v270_v53 }
  0x5f   :  { %523 = vmatprep.subr.mxu0 %v622_v0 }
  0x60   :  { %524 = vmatpush3.msra.mxu0 %v269_v54 }
  0x61   :  { %525 = vmatprep.subr.mxu0 %v622_v0 }
  0x62   :  { %526 = vmatpush3.msra.mxu0 %v268_v55 }
  0x63   :  { %527 = vmatprep.subr.mxu0 %v622_v0 }
  0x64   :  { %528 = vmatpush3.msra.mxu0 %v267_v56 }
  0x65   :  { %529 = vmatprep.subr.mxu0 %v622_v0 }
  0x66   :  { %530 = vmatpush3.msra.mxu0 %v266_v57 }
 0x106   :  { %v157_v35 = vpop.f32.mrf.mxu0 }
 0x107   :  { %v158_v36 = vadd.f32 %v372_v34, %v157_v35 }
 0x108   :  { %v463_v37 = vpop.f32.mrf.mxu0 }
 0x109   :  { %v373_v38 = vmul.f32 -1.442695, %v158_v36 }
 0x10b   :  { %541 = vpow2.f32 %v373_v38 }
 0x118   :  { %v542_v39 = vpop.eup %541 }
 0x119   :  { %v164_v40 = vadd.f32 1.0, %v542_v39 }
 0x11b   :  { %543 = vrcp.f32 %v164_v40 }
 0x128   :  { %v544_v41 = vpop.eup %543 }
 0x129   :  { %497 = vmatmul.mubr.f32.vlgmr.msra.gmra.mxu1 %v544_v41 }
 0x1e9   :  { %v256_v59 = vpop.f32.mrf.mxu1 }
 0x1ea   :  { %v257_v60 = vadd.f32 %v374_v58, %v256_v59 }
 0x1eb   :  { %v498_v61 = vpop.f32.mrf.mxu1 }
 0x1ec   :  { %v375_v62 = vmul.f32 -1.442695, %v257_v60 }
 0x1ee   :  { %545 = vpow2.f32 %v375_v62 }
 0x1fb   :  { %v546_v63 = vpop.eup %545 }
 0x1fc   :  { %v263_v1 = vadd.f32 1.0, %v546_v63 }
 0x1fe   :  { %547 = vrcp.f32 %v263_v1 }
 0x20b   :  { %v548_v2 = vpop.eup %547 }
 0x20c   :  { %532 = vmatmul.mubr.f32.vlgmr.msra.gmra.mxu0 %v548_v2 }
 0x2cc   :  { %v355_v0 = vpop.f32.mrf.mxu0 }
 0x2cd   :  { %v356_v4 = vadd.f32 %v376_v3, %v355_v0 }
 0x2ce   :  { %v533_v5 = vpop.f32.mrf.mxu0 }
 0x2cf   :  { %v377_v6 = vmul.f32 -1.442695, %v356_v4 }
 0x2d1   :  { %549 = vpow2.f32 %v377_v6 }
 0x2de   :  { %v550_v7 = vpop.eup %549 }
 0x2df   :  { %v362_v8 = vadd.f32 1.0, %v550_v7 }
 0x2e1   :  { %551 = vrcp.f32 %v362_v8 }
 0x2ee   :  { %v552_v9 = vpop.eup %551 }
 0x2ef   :  { %365 = vst [vmem:[%s749_s7] sm:$0xff] %v552_v9 }
 0x2f0   :  { %370 = vsyncpa [#allocation3], 1 }
 0x2f1   :  { %371 = vsyncpa [#allocation5], 1 }

</bundles_post_ra>
